<compile_context>
chip_gen: v6e
topology: v6e:2x2x1
jax: 0.10.0
libtpu: 0.0.40
codegen_flags: <defaults>
</compile_context>

<pallas_src>
import numpy as np
import jax
import jax.numpy as jnp
from jax.experimental import pallas as pl
from jax.experimental.pallas import tpu as pltpu

_LANE = 128


def _const_input_kernel(w_ref, o_ref):
    """Replicate the lane-dense weight tile across the batch block.

    w_ref : (rows, 128) constant weight tile in VMEM (same block every step)
    o_ref : (bb, rows, 128) output block holding bb batch copies
    """
    o_ref[...] = jnp.broadcast_to(w_ref[...][None], o_ref.shape)


def _choose_batch_block(batch, plane_bytes, budget_bytes=2 << 20):
    """Largest divisor of `batch` whose output block fits the VMEM budget,
    while keeping >= 2 grid steps when batch >= 2 (feeds both v7x TCs)."""
    max_bb = max(1, budget_bytes // max(plane_bytes, 1))
    cap = min(max_bb, batch)
    if batch >= 2:
        cap = min(cap, (batch + 1) // 2)   # ensure at least 2 grid steps
    for d in range(max(cap, 1), 0, -1):
        if batch % d == 0:
            return d
    return 1


def constant_input_forward(weight, batch):
    """Equivalent of ConstantInput.forward: weight (1,C,H,W) -> (batch,C,H,W)."""
    assert weight.ndim == 4 and weight.shape[0] == 1
    _, c, h, w = weight.shape
    total = c * h * w
    rows = pl.cdiv(total, _LANE)
    total_pad = rows * _LANE

    # ---- glue (plain JAX): flatten + pad to a lane-dense (rows, 128) tile ----
    w_flat = weight.reshape(total)
    if total_pad != total:
        w_flat = jnp.pad(w_flat, (0, total_pad - total))
    w_tile = w_flat.reshape(rows, _LANE)

    plane_bytes = total_pad * weight.dtype.itemsize
    bb = _choose_batch_block(batch, plane_bytes)
    grid = batch // bb

    cost = pl.CostEstimate(
        flops=0,
        transcendentals=0,
        bytes_accessed=plane_bytes * (1 + batch),   # read weight once, write B copies
    )

    out = pl.pallas_call(
        _const_input_kernel,
        out_shape=jax.ShapeDtypeStruct((batch, rows, _LANE), weight.dtype),
        grid=(grid,),
        in_specs=[
            # Constant block index -> the weight tile stays resident in VMEM
            # across grid steps instead of being re-DMA'd from HBM.
            pl.BlockSpec((rows, _LANE), lambda b: (0, 0)),
        ],
        out_specs=pl.BlockSpec((bb, rows, _LANE), lambda b: (b, 0, 0)),
        compiler_params=pltpu.CompilerParams(
            dimension_semantics=("parallel",)),
        cost_estimate=cost,
    )(w_tile)

    out = out.reshape(batch, total_pad)[:, :total]
    return out.reshape(batch, c, h, w)


if __name__ == "__main__":
    key = jax.random.PRNGKey(0)
    num_channel, size, batch = 4, 16, 2

    # The module's learned parameter (1, C, H, W); forward() takes only `batch`.
    weight = jax.random.normal(key, (1, num_channel, size, size), dtype=jnp.float32)

    out = constant_input_forward(weight, batch)
    out = jax.block_until_ready(out)
    assert out.shape == (batch, num_channel, size, size), out.shape

    # Reference: weight.repeat(batch, 1, 1, 1)
    ref = jnp.broadcast_to(weight, (batch, num_channel, size, size))
    np.testing.assert_allclose(np.asarray(out), np.asarray(ref), rtol=0, atol=0)

    print("KERNEL_OK")
</pallas_src>

<mosaic_0001>
module attributes {stable_mosaic.version = 11 : i64} {
  func.func @_const_input_kernel(%arg0: i32, %arg1: memref<8x128xf32, #tpu.memory_space<vmem>>, %arg2: memref<1x8x128xf32, #tpu.memory_space<vmem>>) attributes {dimension_semantics = [#tpu.dimension_semantics<parallel>], iteration_bounds = array<i64: 2>, scalar_prefetch = 0 : i64, scratch_operands = 0 : i64, tpu.core_type = #tpu.core_type<tc>, window_params = [{pipeline_mode = #tpu.pipeline_mode<synchronous>, transform_indices = @transform_0, window_bounds = array<i64: 8, 128>}, {transform_indices = @transform_1, window_bounds = array<i64: 1, 8, 128>}]} {
    %c0 = arith.constant 0 : index
    %c0_0 = arith.constant 0 : index
    %0 = vector.load %arg1[%c0, %c0_0] : memref<8x128xf32, #tpu.memory_space<vmem>>, vector<8x128xf32>
    %1 = vector.shape_cast %0 : vector<8x128xf32> to vector<1x8x128xf32>
    %c0_1 = arith.constant 0 : index
    %c0_2 = arith.constant 0 : index
    %c0_3 = arith.constant 0 : index
    %2 = vector.load %arg2[%c0_1, %c0_2, %c0_3] : memref<1x8x128xf32, #tpu.memory_space<vmem>>, vector<1x8x128xf32>
    tpu.vector_store %arg2[%c0_1, %c0_2, %c0_3], %1 {strides = array<i32>} : memref<1x8x128xf32, #tpu.memory_space<vmem>>, vector<1x8x128xf32>,
    return
  }
  func.func @transform_0(%arg0: i32) -> (i32, i32) {
    %c0_i32 = arith.constant 0 : i32
    %c0_i32_0 = arith.constant 0 : i32
    %c0_i32_1 = arith.constant 0 : i32
    return %c0_i32, %c0_i32_0 : i32, i32
  }
  func.func @transform_1(%arg0: i32) -> (i32, i32, i32) {
    %c0_i32 = arith.constant 0 : i32
    %c0_i32_0 = arith.constant 0 : i32
    %c0_i32_1 = arith.constant 0 : i32
    return %arg0, %c0_i32, %c0_i32_0 : i32, i32, i32
  }
}

</mosaic_0001>

<bundles_post_ra>
// kernel: tpu_custom_call.1
= control target key start
LH: loop header
LB: loop body
LE: loop exit
PB: predicated region body
PF: predicated region fallthrough
CT: control target
= control target key end

     0   :  { %6 = vsyncpa [#allocation3], 0  ;;  %s453_s0 = inlined_call_operand.hbm [shape: f32[8,128], index: 0, kind: input, shape index: {}]   ;;  %s454_s1 = inlined_call_operand.hbm [shape: f32[2,8,128], index: 1, kind: output, shape index: {}]  }
   0x1   :  { %7 = vsyncpa [#allocation4], 0 }
   0x2   :  { %9 = vsyncpa [#allocation4 + $0x1], 0  ;;  %s347_s6 = smov 0   ;;  %s349_s7 = smov 0  }
   0x3   :  { %s351_s8 = smov 0   ;;  %s353_s9 = smov 0  }
   0x4 LB: > { %s368_s10 = sadd.s32 4294967295, %s333_s9   ;;  %s183_s11 = sadd.s32 4294967294, %s333_s9   ;;  %s333_s9 = sphi %s353_s9, %s462_s9   ;;  %s329_s8 = sphi %s351_s8, %s461_s8   ;;  %s325_s7 = sphi %s349_s7, %s460_s7   ;;  %s321_s6 = sphi %s347_s6, %s459_s6  }
   0x5   : > { %s372_s12 = sadd.s32 1, %s333_s9   ;;  %s43_s13 = sadd.s32 1, %s329_s8 }
   0x6   : > { %s40_s14 = ssub.s32 %s333_s9, %s372_s12  ;;  %p53_p0 = scmp.ne.s32.totalorder %s329_s8, %s325_s7 }
   0x7   : > { %p41_p1 = scmp.eq.s32.totalorder %s40_s14, 0  ;;  %p54_p2 = scmp.eq.s32.totalorder %s368_s10, 1 }
   0x8   : > { %p59_p3 = scmp.ne.s32.totalorder %s325_s7, %s321_s6  ;;  %p60_p4 = scmp.eq.s32.totalorder %s183_s11, 1 }
   0x9   : > { %s383_s15 = scalar_select %p41_p1, %s329_s8, %s43_s13  }
   0xa   : > { %p385_p5 = por %p54_p2, %p53_p0  ;;  %p389_p6 = por %p60_p4, %p59_p3 }
   0xb   : > { %p184_p7 = scmp.ge.s32.totalorder %s333_s9, 1  ;;  %p67_p8 = scmp.lt.s32.totalorder %s333_s9, 3 }
   0xc   : > { %s456_s17 = scalar_select %p389_p6, 1, 0 }
   0xd   : > { %p207_p9 = scmp.eq.s32.totalorder %s368_s10, 0  ;;  %p396_p10 = pnand %p184_p7, %p67_p8 }
   0xe   : > { %s335_s19 = smov [#allocation2]  }
   0xf   : > { %s80_s20 = sshll.u32 %s335_s19, 4  ;;  %p199_p11 = pneg %p396_p10  ;;  %s81_s20 = int_to_ptr.vmem [resolvable:$true] %s80_s20 }
  0x10   : > { %s254_s21 = scalar_lea.vmem %s81_s20, 128  ;;  %p262_p3 = scmp.lt.s32.totalorder %s81_s20, %s81_s20 }
  0x11   : > { %p200_p12 = pnand %p207_p9, %p199_p11  ;;  %p255_p0 = scmp.ne.s32.totalorder %s81_s20, %s254_s21 }
  0x12   : > { %p263_p4 = scmp.lt.s32.totalorder %s254_s21, %s254_s21 }
  0x13   : > { %p245_p13 = pneg %p200_p12 }
  0x14   : > { %p264_p6 = por %p263_p4, %p262_p3 }
  0x15   : > { %p257_p1 = pnand %p255_p0, %p245_p13 }
  0x17   : > { %p258_p2 = pneg %p257_p1 }
  0x19   : > { %p265_p7 = pnand %p264_p6, %p258_p2 }
  0x1b   : > { %268 = shalt.err (!%p265_p7)
}
  0x1c   : > { %202 = dma.hbm_to_vmem [thread:$0]  (!%p200_p12), %s453_s0, 128, %s81_s20, [#allocation3]  }
  0x1d   : > { %93 = sbr.rel (%p396_p10) target bundleno = 60 (0x3c), region = 24 }
  0x22   : > { %312 = dma.done.wait (%p207_p9), [#allocation3], 128  }
  0x23   : > { %314 = vsyncadd (%p207_p9), [#allocation3], 4294967168  ;;  %s105_s24 = sand.u32 1, %s325_s7   ;;  %s190_s28 = sshll.u32 %s368_s10, 7  ;;  %v108_v0 = vld [vmem:[#allocation2] sm:$0xff] }
  0x24   : > { %s188_s25 = sshll.u32 %s105_s24, 3  ;;  %s122_s2 = scalar_lea.hbm %s454_s1, %s190_s28 }
  0x25   : > { %s107_s26 = scalar_lea.vmem [#allocation5], %s188_s25  ;;  %s111_s3 = scalar_lea.sflag [#allocation4], %s105_s24 }
  0x26   : > { %s124_s27 = sshll.u32 %s107_s26, 4  ;;  %109 = vst [vmem:[%s107_s26] sm:$0xff] %v108_v0  ;;  %s336_s5 = smov [#allocation5]   ;;  %s415_s27 = int_to_ptr.vmem [resolvable:$true] %s124_s27 }
  0x27   : > { %s269_s4 = scalar_lea.vmem %s415_s27, 128  ;;  %s273_s11 = sshll.u32 %s336_s5, 4  ;;  %s274_s11 = int_to_ptr.vmem [resolvable:$false] %s273_s11 }
  0x28   : > { %p270_p6 = scmp.ne.s32.totalorder %s415_s27, %s269_s4  ;;  %s275_s10 = scalar_lea.vmem %s274_s11, 256 }
  0x29   : > { %p276_p10 = scmp.lt.s32.totalorder %s415_s27, %s274_s11  ;;  %p277_p11 = scmp.lt.s32.totalorder %s275_s10, %s269_s4 }
  0x2a   : > { %p271_p8 = pnand %p270_p6, %p385_p5 }
  0x2b   : > { %p278_p12 = por %p277_p11, %p276_p10 }
  0x2c   : > { %p272_p9 = pneg %p271_p8 }
  0x2e   : > { %p279_p13 = pnand %p278_p12, %p272_p9 }
  0x30   : > { %282 = shalt.err (!%p279_p13)
}
  0x31   : > { %s283_s13 = scalar_lea.hbm %s122_s2, 128  ;;  %s287_s19 = scalar_lea.hbm %s454_s1, 256 }
  0x32   : > { %p284_p0 = scmp.ne.s32.totalorder %s122_s2, %s283_s13  ;;  %p288_p3 = scmp.lt.s32.totalorder %s122_s2, %s454_s1 }
  0x33   : > { %p289_p4 = scmp.lt.s32.totalorder %s287_s19, %s283_s13 }
  0x34   : > { %p285_p1 = pnand %p284_p0, %p385_p5 }
  0x35   : > { %p290_p7 = por %p289_p4, %p288_p3 }
  0x36   : > { %p286_p2 = pneg %p285_p1 }
  0x38   : > { %p291_p6 = pnand %p290_p7, %p286_p2 }
  0x3a   : > { %294 = shalt.err (!%p291_p6)
}
  0x3b   : > { %197 = dma.vmem_to_hbm [thread:$0]  (%p385_p5), %s415_s27, 128, %s122_s2, %s111_s3  }
  0x3c PF: > { %p209_p8 = scmp.ge.s32.totalorder %s333_s9, 2  ;;  %s136_s22 = sand.u32 1, %s321_s6  }
  0x3d   : > { %p458_p9 = scmp.ne.s32.totalorder %s456_s17, 0  ;;  %s137_s23 = scalar_lea.sflag [#allocation4], %s136_s22 }
  0x3f   : > { %p204_p10 = pnand %p209_p8, %p458_p9 }
  0x41   : > { %p205_p11 = pneg %p204_p10 }
  0x43   : > { %316 = dma.done.wait (%p205_p11), %s137_s23, 128  }
  0x44   : > { %318 = vsyncadd (%p205_p11), %s137_s23, 4294967168  ;;  %p12_p12 = scmp.ge.s32.totalorder %s372_s12, 4   ;;  %s459_s6 = smov %s325_s7 }
  0x45   : > { %s460_s7 = smov %s329_s8  ;;  %s461_s8 = smov %s383_s15 }
  0x46   : > { %s462_s9 = smov %s372_s12  ;;  %14 = sbr.rel (!%p12_p12) target bundleno = 4 (0x4), region = 61 }
  0x4b   :  { %142 = vsyncpa [#allocation3], 1 }
  0x4c   :  { %144 = vsyncpa [#allocation3 + $0x1], 1 }
  0x4d   :  { %145 = vsyncpa [#allocation4], 1 }
  0x4e   :  { %147 = vsyncpa [#allocation4 + $0x1], 1 }

</bundles_post_ra>
